<compile_context>
chip_gen: v5e
topology: v5e:2x2
jax: 0.10.0
libtpu: 0.0.40
codegen_flags: <defaults>
</compile_context>

<pallas_src>
import functools

import jax
import jax.numpy as jnp
from jax.experimental import pallas as pl
from jax.experimental.pallas import tpu as pltpu

ALPHA = 0.25
GAMMA = 2.0
LANES = 128
CHUNK_ROWS = 512        # rows per in-kernel reduction chunk (256 KiB f32)
MAX_ROW_TILE = 8192     # rows per grid block: 8192*128*4B = 4 MiB per input


def _round_up(a, m):
    return ((a + m - 1) // m) * m


def _focal_kernel(x_ref, t_ref, out_ref, *, gamma, rows_valid, tile_rows,
                  chunk_rows, last_partial):
    """Writes the (8, 128) partial sum of focal terms for one row tile."""
    n_chunks = tile_rows // chunk_rows
    block_row0 = pl.program_id(0) * tile_rows

    def chunk_partial(r0, masked):
        x = x_ref[pl.ds(r0, chunk_rows), :].astype(jnp.float32)
        t = t_ref[pl.ds(r0, chunk_rows), :].astype(jnp.float32)
        # binary_cross_entropy_with_logits (numerically stable form):
        #   bce = max(x, 0) - x*t + log1p(exp(-|x|))
        bce = jnp.maximum(x, 0.0) - x * t + jnp.log1p(jnp.exp(-jnp.abs(x)))
        pt = jnp.exp(-bce)                 # exact for soft targets too
        one_m_pt = 1.0 - pt
        if gamma == 2.0:
            mod = one_m_pt * one_m_pt      # VPU square, no pow on the EUP
        else:
            mod = jnp.power(one_m_pt, gamma)
        f = mod * bce                      # alpha applied once in the wrapper
        if masked:
            # Zero rows past the end of the (rows, 128) array: only the last
            # grid block can overrun it.  Row-level compare avoids int32
            # flat-index overflow; the select drops any garbage/NaN read from
            # the out-of-bounds region.
            row_idx = (jax.lax.broadcasted_iota(jnp.int32, f.shape, 0)
                       + block_row0 + r0)
            f = jnp.where(row_idx < rows_valid, f, 0.0)
        # (chunk_rows, 128) -> (8, 128): pure vreg-wise VPU adds; the single
        # cross-lane reduction happens once in the wrapper on tiny partials.
        return f.reshape(chunk_rows // 8, 8, LANES).sum(axis=0)

    def tile_partial(masked):
        if n_chunks == 1:
            return chunk_partial(0, masked)

        def body(c, acc):
            r0 = pl.multiple_of(c * chunk_rows, chunk_rows)
            return acc + chunk_partial(r0, masked)

        return jax.lax.fori_loop(0, n_chunks, body,
                                 jnp.zeros((8, LANES), jnp.float32))

    if last_partial:
        is_last = pl.program_id(0) == pl.num_programs(0) - 1

        @pl.when(is_last)
        def _():
            out_ref[...] = tile_partial(True).reshape(1, 8, LANES)

        @pl.when(jnp.logical_not(is_last))
        def _():
            out_ref[...] = tile_partial(False).reshape(1, 8, LANES)
    else:
        out_ref[...] = tile_partial(False).reshape(1, 8, LANES)


def focal_loss(inputs, targets, alpha=ALPHA, gamma=GAMMA, reduction="mean"):
    """Focal loss matching the PyTorch FocalLoss.forward semantics."""
    assert inputs.shape == targets.shape
    n = inputs.size                        # static Python int
    rows = pl.cdiv(n, LANES)

    # Lane padding only (no full-tile padding): pad values are chosen so the
    # padded elements contribute exactly 0 (bce=0, pt=1 => f=0) and need no
    # in-kernel masking.  Skipped entirely when n % 128 == 0.
    lane_pad = (-n) % LANES
    x_flat = inputs.reshape(-1)
    t_flat = targets.reshape(-1)
    if lane_pad:
        x_flat = jnp.pad(x_flat, (0, lane_pad), constant_values=-1e4)
        t_flat = jnp.pad(t_flat, (0, lane_pad), constant_values=0)
    x2 = x_flat.reshape(rows, LANES)
    t2 = t_flat.reshape(rows, LANES)

    # Row-tile selection: multiples of 8 (and of CHUNK_ROWS when large),
    # capped at 4 MiB per input per pipeline buffer, and sized for >= 2
    # blocks when possible so the "parallel" grid axis can be split across
    # v7x's two TensorCores.  The last block may overrun `rows`.
    if rows < 16:
        tile_rows = _round_up(rows, 8)
    elif rows < 2 * CHUNK_ROWS:
        tile_rows = min(MAX_ROW_TILE, _round_up(pl.cdiv(rows, 2), 8))
    else:
        tile_rows = min(MAX_ROW_TILE, _round_up(pl.cdiv(rows, 2), CHUNK_ROWS))
    chunk_rows = min(CHUNK_ROWS, tile_rows)
    num_blocks = pl.cdiv(rows, tile_rows)
    last_partial = (rows % tile_rows) != 0

    tile_spec = pl.BlockSpec((tile_rows, LANES), lambda i: (i, 0))

    partials = pl.pallas_call(
        functools.partial(
            _focal_kernel,
            gamma=gamma,
            rows_valid=rows,
            tile_rows=tile_rows,
            chunk_rows=chunk_rows,
            last_partial=last_partial,
        ),
        out_shape=jax.ShapeDtypeStruct((num_blocks, 8, LANES), jnp.float32),
        grid_spec=pltpu.PrefetchScalarGridSpec(
            num_scalar_prefetch=0,
            grid=(num_blocks,),
            in_specs=[tile_spec, tile_spec],
            out_specs=pl.BlockSpec((1, 8, LANES), lambda i: (i, 0, 0)),
        ),
        compiler_params=pltpu.CompilerParams(
            dimension_semantics=("parallel",),   # independent blocks
        ),
    )(x2, t2)

    total = alpha * jnp.sum(partials)      # alpha hoisted out of the kernel

    if reduction == "mean":
        return total / jnp.float32(n)
    elif reduction == "sum":
        return total
    else:
        # TODO(synk): 'none' reduction would need an elementwise output
        # kernel; the reference default is 'mean', implemented here.
        raise NotImplementedError("only 'mean' and 'sum' reductions supported")


def _focal_loss_ref(inputs, targets, alpha=ALPHA, gamma=GAMMA):
    x = inputs.astype(jnp.float32)
    t = targets.astype(jnp.float32)
    bce = jnp.maximum(x, 0.0) - x * t + jnp.log1p(jnp.exp(-jnp.abs(x)))
    pt = jnp.exp(-bce)
    return jnp.mean(alpha * (1.0 - pt) ** gamma * bce)


if __name__ == "__main__":
    key = jax.random.PRNGKey(0)
    k1, k2 = jax.random.split(key)
    # NCHW logits and binary targets, small shapes.
    x = jax.random.normal(k1, (2, 4, 16, 16), dtype=jnp.float32)
    y = (jax.random.uniform(k2, (2, 4, 16, 16)) > 0.5).astype(jnp.float32)

    out = focal_loss(x, y)
    out = jax.block_until_ready(out)

    ref = _focal_loss_ref(x, y)
    assert jnp.allclose(out, ref, rtol=1e-5, atol=1e-6), (out, ref)
    print("KERNEL_OK")
</pallas_src>

<mosaic_0001>
module attributes {stable_mosaic.version = 11 : i64} {
  func.func @_focal_kernel(%arg0: i32, %arg1: memref<8x128xf32, #tpu.memory_space<vmem>>, %arg2: memref<8x128xf32, #tpu.memory_space<vmem>>, %arg3: memref<1x8x128xf32, #tpu.memory_space<vmem>>) attributes {dimension_semantics = [#tpu.dimension_semantics<parallel>], iteration_bounds = array<i64: 2>, scalar_prefetch = 0 : i64, scratch_operands = 0 : i64, tpu.core_type = #tpu.core_type<tc>, window_params = [{transform_indices = @transform_0, window_bounds = array<i64: 8, 128>}, {transform_indices = @transform_1, window_bounds = array<i64: 8, 128>}, {transform_indices = @transform_2, window_bounds = array<i64: 1, 8, 128>}]} {
    %c0 = arith.constant 0 : index
    %c0_0 = arith.constant 0 : index
    %0 = vector.load %arg1[%c0, %c0_0] : memref<8x128xf32, #tpu.memory_space<vmem>>, vector<8x128xf32>
    %c0_1 = arith.constant 0 : index
    %c0_2 = arith.constant 0 : index
    %1 = vector.load %arg2[%c0_1, %c0_2] : memref<8x128xf32, #tpu.memory_space<vmem>>, vector<8x128xf32>
    %cst = arith.constant 0.000000e+00 : f32
    %2 = vector.broadcast %cst : f32 to vector<8x128xf32>
    %3 = arith.maximumf %0, %2 : vector<8x128xf32>
    %4 = arith.mulf %0, %1 : vector<8x128xf32>
    %5 = arith.subf %3, %4 : vector<8x128xf32>
    %6 = math.absf %0 : vector<8x128xf32>
    %cst_3 = arith.constant 0.000000e+00 : f32
    %7 = vector.broadcast %cst_3 : f32 to vector<8x128xf32>
    %8 = arith.subf %7, %6 : vector<8x128xf32>
    %9 = math.exp %8 : vector<8x128xf32>
    %10 = math.log1p %9 : vector<8x128xf32>
    %11 = arith.addf %5, %10 : vector<8x128xf32>
    %cst_4 = arith.constant 0.000000e+00 : f32
    %12 = vector.broadcast %cst_4 : f32 to vector<8x128xf32>
    %13 = arith.subf %12, %11 : vector<8x128xf32>
    %14 = math.exp %13 : vector<8x128xf32>
    %cst_5 = arith.constant 1.000000e+00 : f32
    %15 = vector.broadcast %cst_5 : f32 to vector<8x128xf32>
    %16 = arith.subf %15, %14 : vector<8x128xf32>
    %17 = arith.mulf %16, %16 : vector<8x128xf32>
    %18 = arith.mulf %17, %11 : vector<8x128xf32>
    %19 = vector.shape_cast %18 : vector<8x128xf32> to vector<1x8x128xf32>
    %cst_6 = arith.constant dense<0.000000e+00> : vector<8x128xf32>
    %20 = vector.multi_reduction <add>, %19, %cst_6 [0] : vector<1x8x128xf32> to vector<8x128xf32>
    %21 = vector.shape_cast %20 : vector<8x128xf32> to vector<1x8x128xf32>
    %c0_7 = arith.constant 0 : index
    %c0_8 = arith.constant 0 : index
    %c0_9 = arith.constant 0 : index
    %22 = vector.load %arg3[%c0_7, %c0_8, %c0_9] : memref<1x8x128xf32, #tpu.memory_space<vmem>>, vector<1x8x128xf32>
    tpu.vector_store %arg3[%c0_7, %c0_8, %c0_9], %21 {strides = array<i32>} : memref<1x8x128xf32, #tpu.memory_space<vmem>>, vector<1x8x128xf32>,
    return
  }
  func.func @transform_0(%arg0: i32) -> (i32, i32) {
    %c0_i32 = arith.constant 0 : i32
    %c0_i32_0 = arith.constant 0 : i32
    return %arg0, %c0_i32 : i32, i32
  }
  func.func @transform_1(%arg0: i32) -> (i32, i32) {
    %c0_i32 = arith.constant 0 : i32
    %c0_i32_0 = arith.constant 0 : i32
    return %arg0, %c0_i32 : i32, i32
  }
  func.func @transform_2(%arg0: i32) -> (i32, i32, i32) {
    %c0_i32 = arith.constant 0 : i32
    %c0_i32_0 = arith.constant 0 : i32
    %c0_i32_1 = arith.constant 0 : i32
    return %arg0, %c0_i32, %c0_i32_0 : i32, i32, i32
  }
}

</mosaic_0001>

<bundles_post_ra>
// kernel: tpu_custom_call.1
= control target key start
LH: loop header
LB: loop body
LE: loop exit
PB: predicated region body
PF: predicated region fallthrough
CT: control target
= control target key end

     0   :  { %7 = vsyncpa [#allocation3], 0  ;;  %s720_s0 = inlined_call_operand.hbm [shape: f32[16,128], index: 0, kind: input, shape index: {}]   ;;  %s721_s1 = inlined_call_operand.hbm [shape: f32[16,128], index: 1, kind: input, shape index: {}]   ;;  %s722_s2 = inlined_call_operand.hbm [shape: f32[2,8,128], index: 2, kind: output, shape index: {}]  }
   0x1   :  { %9 = vsyncpa [#allocation3 + $0x1], 0 }
   0x2   :  { %10 = vsyncpa [#allocation6], 0 }
   0x3   :  { %12 = vsyncpa [#allocation6 + $0x1], 0 }
   0x4   :  { %13 = vsyncpa [#allocation4], 0 }
   0x5   :  { %15 = vsyncpa [#allocation4 + $0x1], 0  ;;  %s555_s9 = smov 0   ;;  %s557_s10 = smov 0  }
   0x6   :  { %s559_s11 = smov 0   ;;  %s561_s12 = smov 0  }
   0x7 LB: > { %s576_s13 = sadd.s32 4294967295, %s538_s12   ;;  %s336_s14 = sadd.s32 4294967294, %s538_s12   ;;  %s538_s12 = sphi %s561_s12, %s733_s12   ;;  %s534_s11 = sphi %s559_s11, %s732_s11   ;;  %s530_s10 = sphi %s557_s10, %s731_s10   ;;  %s526_s9 = sphi %s555_s9, %s730_s9  }
   0x8   : > { %s580_s15 = sadd.s32 1, %s538_s12   ;;  %s28_s16 = sadd.s32 1, %s534_s11 }
   0x9   : > { %s25_s17 = ssub.s32 %s538_s12, %s580_s15  ;;  %p35_p0 = scmp.ne.s32.totalorder %s534_s11, %s530_s10 }
   0xa   : > { %p26_p1 = scmp.eq.s32.totalorder %s25_s17, 0  ;;  %p36_p2 = scmp.eq.s32.totalorder %s538_s12, 0 }
   0xb   : > { %p41_p3 = scmp.ne.s32.totalorder %s530_s10, %s526_s9  ;;  %p42_p4 = scmp.eq.s32.totalorder %s576_s13, 0 }
   0xc   : > { %s592_s18 = scalar_select %p26_p1, %s534_s11, %s28_s16  }
   0xd   : > { %p594_p5 = por %p36_p2, %p35_p0  ;;  %p598_p6 = por %p42_p4, %p41_p3 }
   0xe   : > { %p91_p7 = scmp.eq.s32.totalorder %s576_s13, 1  ;;  %p97_p8 = scmp.eq.s32.totalorder %s336_s14, 1 }
   0xf   : > { %p368_p10 = scmp.lt.s32.totalorder %s538_s12, 2  ;;  %s614_s23 = sand.u32 1, %s534_s11  }
  0x10   : > { %p605_p11 = por %p91_p7, %p35_p0  ;;  %p609_p12 = por %p97_p8, %p41_p3 }
  0x11   : > { %s340_s24 = sshll.u32 %s538_s12, 3  ;;  %s339_s25 = sshll.u32 %s614_s23, 3 }
  0x12   : > { %s125_s28 = scalar_lea.hbm %s720_s0, %s340_s24  ;;  %s121_s30 = scalar_lea.vmem [#allocation2], %s339_s25 }
  0x13   : > { %s127_s29 = sshll.u32 %s125_s28, 4  ;;  %s129_s3 = sshll.u32 %s121_s30, 4  ;;  %s128_s29 = int_to_ptr.hbm [resolvable:$true] %s127_s29  ;;  %s130_s3 = int_to_ptr.vmem [resolvable:$true] %s129_s3 }
  0x14   : > { %p623_p13 = pnand %p368_p10, %p594_p5  ;;  %p343_p0 = scmp.ge.s32.totalorder %s538_s12, 1 }
  0x15   : > { %p153_p1 = scmp.lt.s32.totalorder %s538_s12, 3  ;;  %s118_s5 = scalar_lea.sflag [#allocation3], %s614_s23 }
  0x16   : > { %s408_s6 = sshra.s32 %s128_s29, 4  ;;  %p412_p3 = pneg %p623_p13  ;;  %s409_s6 = int_to_ptr.hbm [resolvable:$true] %s408_s6 }
  0x17   : > { %s410_s7 = scalar_lea.hbm %s409_s6, 8  ;;  %s415_s16 = scalar_lea.hbm %s720_s0, 16 }
  0x18   : > { %p411_p2 = scmp.ne.s32.totalorder %s409_s6, %s410_s7  ;;  %p416_p5 = scmp.lt.s32.totalorder %s409_s6, %s720_s0 }
  0x19   : > { %p417_p8 = scmp.lt.s32.totalorder %s415_s16, %s410_s7 }
  0x1a   : > { %p413_p4 = pnand %p412_p3, %p411_p2 }
  0x1b   : > { %p418_p10 = por %p417_p8, %p416_p5 }
  0x1c   : > { %p414_p7 = pneg %p413_p4 }
  0x1e   : > { %p419_p9 = pnand %p418_p10, %p414_p7 }
  0x20   : > { %422 = shalt.err (!%p419_p9)
}
  0x21   : > { %360 = dma.hbm_to_vmem [thread:$0]  (!%p623_p13), %s128_s29, 128, %s130_s3, %s118_s5  }
  0x22   : > { %p647_p2 = pnand %p343_p0, %p153_p1  ;;  %s144_s30 = scalar_lea.hbm %s721_s1, %s340_s24 }
  0x23   : > { %s146_s6 = sshll.u32 %s144_s30, 4  ;;  %s140_s7 = scalar_lea.vmem [#allocation5], %s339_s25  ;;  %s147_s6 = int_to_ptr.hbm [resolvable:$true] %s146_s6 }
  0x24   : > { %s148_s8 = sshll.u32 %s140_s7, 4  ;;  %s137_s14 = scalar_lea.sflag [#allocation6], %s614_s23  ;;  %s149_s8 = int_to_ptr.vmem [resolvable:$true] %s148_s8 }
  0x25   : > { %s438_s16 = sshra.s32 %s147_s6, 4  ;;  %s445_s5 = scalar_lea.hbm %s721_s1, 16  ;;  %s439_s16 = int_to_ptr.hbm [resolvable:$true] %s438_s16 }
  0x26   : > { %s440_s17 = scalar_lea.hbm %s439_s16, 8  ;;  %p446_p4 = scmp.lt.s32.totalorder %s439_s16, %s721_s1 }
  0x27   : > { %p441_p9 = scmp.ne.s32.totalorder %s439_s16, %s440_s17  ;;  %p447_p7 = scmp.lt.s32.totalorder %s445_s5, %s440_s17 }
  0x29   : > { %p443_p0 = pnand %p441_p9, %p412_p3  ;;  %p448_p5 = por %p447_p7, %p446_p4 }
  0x2b   : > { %p444_p1 = pneg %p443_p0 }
  0x2d   : > { %p449_p8 = pnand %p448_p5, %p444_p1 }
  0x2f   : > { %452 = shalt.err (!%p449_p8)
}
  0x30   : > { %363 = dma.hbm_to_vmem [thread:$0]  (!%p623_p13), %s147_s6, 128, %s149_s8, %s137_s14  }
  0x31   : > { %157 = sbr.rel (%p647_p2) target bundleno = 105 (0x69), region = 28  ;;  %s669_s23 = sand.u32 (!%p647_p2), 1, %s530_s10  }
  0x32   : > { %s672_s25 = sshll.u32 (!%p647_p2), %s669_s23, 3  ;;  %s160_s27 = scalar_lea.sflag (!%p647_p2), [#allocation3], %s669_s23 }
  0x33   : > { %s163_s28 = scalar_lea.vmem (!%p647_p2), [#allocation2], %s672_s25 }
  0x36   : > { %513 = dma.done.wait (%p598_p6), %s160_s27, 128  }
  0x37   : > { %515 = vsyncadd (%p598_p6), %s160_s27, 4294967168  ;;  %s170_s4 = scalar_lea.sflag [#allocation6], %s669_s23  ;;  %s173_s26 = scalar_lea.vmem [#allocation5], %s672_s25 }
  0x38   : > { %517 = dma.done.wait (%p598_p6), %s170_s4, 128  }
  0x39   : > { %519 = vsyncadd (%p598_p6), %s170_s4, 4294967168  ;;  %v200_v0 = vld [vmem:[%s163_s28] sm:$0xff]  ;;  %v201_v7 = vld [vmem:[%s173_s26] sm:$0xff]  ;;  %s348_s20 = sshll.u32 %s576_s13, 3  ;;  %s199_s8 = scalar_lea.vmem [#allocation7], %s672_s25 }
  0x3a   : > { %v205_v1 = vand.u32 2147483647, %v200_v0  ;;  %v202_v9 = vmax.f32 %v200_v0, 0.0  ;;  %v203_v10 = vmul.f32 %v201_v7, %v200_v0  ;;  %s238_s7 = scalar_lea.hbm %s722_s2, %s348_s20  ;;  %s240_s14 = sshll.u32 %s199_s8, 4  ;;  %s241_s14 = int_to_ptr.vmem [resolvable:$true] %s240_s14 }
  0x3b   : > { %s242_s16 = sshll.u32 %s238_s7, 4  ;;  %s228_s17 = scalar_lea.sflag [#allocation4], %s669_s23  ;;  %s243_s16 = int_to_ptr.hbm [resolvable:$true] %s242_s16 }
  0x3c   : > { %v206_v2 = vsub.f32 0.0, %v205_v1  ;;  %v204_v14 = vsub.f32 %v202_v9, %v203_v10  ;;  %s482_s29 = sshra.s32 %s243_s16, 4  ;;  %s488_s19 = scalar_lea.hbm %s722_s2, 16  ;;  %s483_s29 = int_to_ptr.hbm [resolvable:$true] %s482_s29 }
  0x3d   : > { %s484_s3 = scalar_lea.hbm %s483_s29, 8  ;;  %p489_p10 = scmp.lt.s32.totalorder %s483_s29, %s722_s2 }
  0x3e   : > { %v207_v3 = vmul.f32 1.442695, %v206_v2  ;;  %p485_p6 = scmp.ne.s32.totalorder %s483_s29, %s484_s3  ;;  %p490_p2 = scmp.lt.s32.totalorder %s488_s19, %s484_s3 }
  0x40   : > { %402 = vpow2.f32 %v207_v3  ;;  %p486_p13 = pnand %p485_p6, %p605_p11  ;;  %p491_p9 = por %p490_p2, %p489_p10 }
  0x42   : > { %p487_p3 = pneg %p486_p13 }
  0x44   : > { %p492_p0 = pnand %p491_p9, %p487_p3 }
  0x46   : > { %v403_v4 = vpop.eup %402 }
  0x47   : > { %v209_v5 = vadd.f32 1.0, %v403_v4  ;;  %v212_v6 = vmul.f32 -0.5, %v403_v4  ;;  %v215_v11 = vand.u32 2147483647, %v403_v4 }
  0x49   : > { %404 = vlog2.f32 %v209_v5  ;;  %v213_v8 = vadd.f32 1.0, %v212_v6  ;;  %vm216_vm0 = vcmp.lt.f32.partialorder %v215_v11, 0.0004427343 }
  0x4b   : > { %v214_v12 = vmul.f32 %v403_v4, %v213_v8 }
  0x4f   : > { %v405_v13 = vpop.eup %404 }
  0x50   : > { %v211_v15 = vmul.f32 0.6931472, %v405_v13 }
  0x52   : > { %v217_v16 = vsel %vm216_vm0, %v214_v12, %v211_v15 }
  0x53   : > { %v218_v17 = vadd.f32 %v217_v16, %v204_v14 }
  0x55   : > { %v219_v18 = vsub.f32 0.0, %v218_v17 }
  0x57   : > { %v220_v19 = vmul.f32 1.442695, %v219_v18 }
  0x59   : > { %406 = vpow2.f32 %v220_v19 }
  0x5f   : > { %v407_v20 = vpop.eup %406 }
  0x60   : > { %v222_v21 = vsub.f32 1.0, %v407_v20 }
  0x62   : > { %v223_v22 = vmul.f32 %v222_v21, %v222_v21 }
  0x64   : > { %v224_v23 = vmul.f32 %v223_v22, %v218_v17 }
  0x66   : > { %226 = vst [vmem:[%s199_s8] sm:$0xff] %v224_v23 }
  0x67   : > { %495 = shalt.err (!%p492_p0)
}
  0x68   : > { %355 = dma.vmem_to_hbm [thread:$0]  (%p605_p11), %s241_s14, 128, %s243_s16, %s228_s17  }
  0x69 PF: > { %s254_s23 = sand.u32 1, %s526_s9   ;;  %p729_p1 = scmp.ge.s32.totalorder %s538_s12, 2 }
  0x6a   : > { %s255_s27 = scalar_lea.sflag [#allocation4], %s254_s23 }
  0x6b   : > { %p365_p4 = pnand %p729_p1, %p609_p12 }
  0x6d   : > { %p366_p7 = pneg %p365_p4 }
  0x6f   : > { %521 = dma.done.wait (%p366_p7), %s255_s27, 128  }
  0x70   : > { %523 = vsyncadd (%p366_p7), %s255_s27, 4294967168  ;;  %p18_p5 = scmp.ge.s32.totalorder %s580_s15, 4   ;;  %s730_s9 = smov %s530_s10 }
  0x71   : > { %s731_s10 = smov %s534_s11  ;;  %s732_s11 = smov %s592_s18 }
  0x72   : > { %s733_s12 = smov %s580_s15  ;;  %20 = sbr.rel (!%p18_p5) target bundleno = 7 (0x7), region = 86 }
  0x77   :  { %261 = vsyncpa [#allocation3], 1 }
  0x78   :  { %263 = vsyncpa [#allocation3 + $0x1], 1 }
  0x79   :  { %264 = vsyncpa [#allocation6], 1 }
  0x7a   :  { %266 = vsyncpa [#allocation6 + $0x1], 1 }
  0x7b   :  { %267 = vsyncpa [#allocation4], 1 }
  0x7c   :  { %269 = vsyncpa [#allocation4 + $0x1], 1 }

</bundles_post_ra>
